<compile_context>
chip_gen: v7x
topology: tpu7x:2x2x1
jax: 0.10.0
libtpu: 0.0.40
codegen_flags: <defaults>
</compile_context>

<pallas_src>
import functools

import jax
import jax.numpy as jnp
from jax.experimental import pallas as pl
from jax.experimental.pallas import tpu as pltpu


_NEG_MASKED = -1e11    # module's fill value for non-edges
_NEG_PAD = -1e30       # padded columns: exp() underflows to exactly 0.0 in f32


def _round_up(v, m):
    return ((v + m - 1) // m) * m


def _leaky_relu(x, slope=0.2):
    return jnp.where(x > 0, x, slope * x)


def _vmem_capacity_bytes():
    """Best-effort physical VMEM query (v5e/v6e: 128 MiB, v7x: 64 MiB per core)."""
    try:
        return int(pltpu.get_tpu_info().vmem_capacity_bytes)
    except Exception:
        return 64 * 1024 * 1024  # conservative fallback (v7x class)


# ---------------------------------------------------------------------------
# Stage 1: feature projection + per-node attention coefficients (row-tiled).
#   H (bf16) = x @ W.T ;  c_packed[:,0] = lrelu(H @ t_s.T), c_packed[:,1] = lrelu(H @ t_r.T)
# ---------------------------------------------------------------------------
def _project_kernel(x_ref, wt_ref, tst_ref, h_ref, c_ref):
    h = jnp.dot(x_ref[...], wt_ref[...], preferred_element_type=jnp.float32)
    h_ref[...] = h.astype(h_ref.dtype)
    c = jnp.dot(h, tst_ref[...], preferred_element_type=jnp.float32)
    c_ref[...] = _leaky_relu(c)          # lanes 2..127 stay exactly 0


# ---------------------------------------------------------------------------
# Stage 2: masked attention, flash-style online softmax over column (K) tiles,
# and aggregation.  For one (TM, TK) graph tile:
#   score_ij = g0_ij * (e_j*u_i + e_i*v_j)      (== mask_ij*(c1_i+c2_j)/2)
#   s = score where g0 > 0 else (-1e11 real col / -1e30 padded col)
#   online softmax accumulate:  acc += P_tile @ H_tile (bf16 MXU, f32 acc)
#   final:  out = 0.5 * (acc / l + H_row_tile)   (== D3 (P+I) D3 @ H)
# ---------------------------------------------------------------------------
def _attention_kernel(g_ref, ecol_ref, ucol_ref, erow_ref, vrow_ref, neg_ref,
                      hk_ref, hres_ref, out_ref, m_scr, l_scr, acc_scr):
    k = pl.program_id(1)

    @pl.when(k == 0)
    def _():
        m_scr[...] = jnp.full_like(m_scr, _NEG_PAD)
        l_scr[...] = jnp.zeros_like(l_scr)
        acc_scr[...] = jnp.zeros_like(acc_scr)

    g = g_ref[...].astype(jnp.float32)
    score = g * (erow_ref[...] * ucol_ref[...] + ecol_ref[...] * vrow_ref[...])
    s = jnp.where(g > 0.0, score, neg_ref[...])

    m_prev = m_scr[...]
    m_new = jnp.maximum(m_prev, jnp.max(s, axis=1, keepdims=True))
    alpha = jnp.exp(m_prev - m_new)
    p = jnp.exp(s - m_new)
    l_scr[...] = alpha * l_scr[...] + jnp.sum(p, axis=1, keepdims=True)
    acc_scr[...] = alpha * acc_scr[...] + jnp.dot(
        p.astype(jnp.bfloat16), hk_ref[...], preferred_element_type=jnp.float32)
    m_scr[...] = m_new

    @pl.when(k == pl.num_programs(1) - 1)
    def _():
        inv_l = pl.reciprocal(l_scr[...], approx=True)
        out_ref[...] = (0.5 * (acc_scr[...] * inv_l
                               + hres_ref[...].astype(jnp.float32))
                        ).astype(out_ref.dtype)


@functools.partial(jax.jit, static_argnames=("tile_m", "tile_k"))
def graph_conv(x, graph, weight, t_s, t_r, tile_m=None, tile_k=None):
    """GraphConv forward. x:(N,F_in), graph:(N,N), weight:(F_out,F_in), t_s/t_r:(1,F_out)."""
    x = x.astype(jnp.float32)
    graph = graph.astype(jnp.float32)
    n, f_in = x.shape
    f_out = weight.shape[0]
    f_pad = _round_up(f_out, 128)            # lane-dense H and output stores

    # ---- chip-aware tile selection (flash layout: VMEM is O(TM*TK + TK*F_pad)) ----
    vmem_cap = _vmem_capacity_bytes()
    vmem_limit = min(96 * 1024 * 1024, (vmem_cap * 3) // 4)
    budget = (vmem_limit * 3) // 5

    tile_m = 512 if tile_m is None else tile_m
    tile_k = 1024 if tile_k is None else tile_k
    tile_m = min(tile_m, _round_up(n, 16))
    tile_k = min(tile_k, _round_up(n, 128))
    tile_m = max(16, tile_m - tile_m % 16)        # bf16 sublane tiling
    tile_k = max(128, tile_k - tile_k % 128)      # lane tiling

    def footprint(tm, tk):
        # double-buffered bf16 graph tile + ~8 live (tm,tk) f32 temps (g/score/s/p/...)
        # + double-buffered bf16 H column/residual tiles + f32 output block + f32 acc.
        return (2 * tm * tk * 2 + 8 * tm * tk * 4
                + 2 * tk * f_pad * 2 + 2 * tm * f_pad * 2
                + 2 * tm * f_pad * 4 + tm * f_pad * 4)

    while tile_k > 128 and footprint(tile_m, tile_k) > budget:
        tile_k = max(128, ((tile_k // 2) // 128) * 128)
    while tile_m > 16 and footprint(tile_m, tile_k) > budget:
        tile_m = max(16, ((tile_m // 2) // 16) * 16)

    n_rows = _round_up(n, tile_m)                       # row padding (output rows)
    n_cols = _round_up(n, tile_k)                       # column padding (softmax axis)
    n_h = _round_up(max(n_rows, n_cols), tile_m)        # H / x row padding

    # ---- degree / normalisation vectors (O(N)/O(N^2), kept f32 => exact for weighted
    # graphs); mask_ij == e_i * G0_ij * e_j -----------------------------------------
    diag = jnp.diagonal(graph)
    rs1 = jnp.sum(graph, axis=1) - diag                 # rowsum of diag-zeroed graph
    d1 = jax.lax.rsqrt(jnp.where(rs1 == 0.0, 1.0, rs1))
    t = graph @ d1
    rs2 = d1 * (t - diag * d1)                          # rowsum of D1 G0 D1
    d2 = jax.lax.rsqrt(jnp.where(rs2 == 0.0, 1.0, rs2))
    e = d1 * d2

    # ---- padded, diagonal-zeroed bf16 graph copy streamed by stage 2 -----------------
    # TODO(synk): fuse pad + diag-zero + cast + rowsum into one Pallas prep pass to cut
    # the remaining wrapper-side f32 graph reads roughly in half.
    gpad = jnp.pad(graph, ((0, n_rows - n), (0, n_cols - n)))
    ridx = jnp.arange(n_rows, dtype=jnp.int32)[:, None]
    cidx = jnp.arange(n_cols, dtype=jnp.int32)[None, :]
    gb = jnp.where(ridx == cidx, 0.0, gpad).astype(jnp.bfloat16)

    # ---- parameters, lane-padded ------------------------------------------------------
    xp = jnp.pad(x, ((0, n_h - n), (0, 0)))
    wt = jnp.pad(weight.astype(jnp.float32), ((0, f_pad - f_out), (0, 0))).T   # (F_in,F_pad)
    tst = jnp.zeros((f_pad, 128), jnp.float32)          # lane 0 = t_s, lane 1 = t_r
    tst = tst.at[:f_out, 0].set(t_s.astype(jnp.float32)[0])
    tst = tst.at[:f_out, 1].set(t_r.astype(jnp.float32)[0])

    # ---- stage 1: H (bf16) + lane-packed attention coefficients ------------------------
    h_bf, cpk = pl.pallas_call(
        _project_kernel,
        out_shape=(jax.ShapeDtypeStruct((n_h, f_pad), jnp.bfloat16),
                   jax.ShapeDtypeStruct((n_h, 128), jnp.float32)),
        grid=(n_h // tile_m,),
        in_specs=[pl.BlockSpec((tile_m, f_in), lambda i: (i, 0)),
                  pl.BlockSpec((f_in, f_pad), lambda i: (0, 0)),
                  pl.BlockSpec((f_pad, 128), lambda i: (0, 0))],
        out_specs=(pl.BlockSpec((tile_m, f_pad), lambda i: (i, 0)),
                   pl.BlockSpec((tile_m, 128), lambda i: (i, 0))),
        compiler_params=pltpu.CompilerParams(dimension_semantics=("parallel",)),
    )(xp, wt, tst)

    c1 = cpk[:n, 0]
    c2 = cpk[:n, 1]
    u = 0.5 * e * c1                 # fold the /2 and the row-side degree scaling
    v = 0.5 * e * c2                 # fold the /2 and the column-side degree scaling

    e_col = jnp.pad(e, (0, n_rows - n)).reshape(n_rows, 1)
    u_col = jnp.pad(u, (0, n_rows - n)).reshape(n_rows, 1)
    e_row = jnp.pad(e, (0, n_cols - n)).reshape(1, n_cols)
    v_row = jnp.pad(v, (0, n_cols - n)).reshape(1, n_cols)
    neg_row = jnp.where(jnp.arange(n_cols) < n, _NEG_MASKED, _NEG_PAD
                        ).astype(jnp.float32).reshape(1, n_cols)

    # ---- stage 2: flash-style masked softmax + aggregation (rows parallel, K arbitrary) ----
    out = pl.pallas_call(
        _attention_kernel,
        out_shape=jax.ShapeDtypeStruct((n_rows, f_pad), jnp.float32),
        grid=(n_rows // tile_m, n_cols // tile_k),
        in_specs=[pl.BlockSpec((tile_m, tile_k), lambda i, k: (i, k)),   # graph tile (bf16)
                  pl.BlockSpec((tile_m, 1), lambda i, k: (i, 0)),        # e (rows of tile)
                  pl.BlockSpec((tile_m, 1), lambda i, k: (i, 0)),        # u = 0.5*e*c1
                  pl.BlockSpec((1, tile_k), lambda i, k: (0, k)),        # e (columns of tile)
                  pl.BlockSpec((1, tile_k), lambda i, k: (0, k)),        # v = 0.5*e*c2
                  pl.BlockSpec((1, tile_k), lambda i, k: (0, k)),        # non-edge / pad fill
                  pl.BlockSpec((tile_k, f_pad), lambda i, k: (k, 0)),    # H column tile (bf16)
                  pl.BlockSpec((tile_m, f_pad), lambda i, k: (i, 0))],   # H residual tile (bf16)
        out_specs=pl.BlockSpec((tile_m, f_pad), lambda i, k: (i, 0)),
        scratch_shapes=[pltpu.VMEM((tile_m, 1), jnp.float32),            # running max m
                        pltpu.VMEM((tile_m, 1), jnp.float32),            # running denom l
                        pltpu.VMEM((tile_m, f_pad), jnp.float32)],       # accumulator
        compiler_params=pltpu.CompilerParams(
            dimension_semantics=("parallel", "arbitrary"),
            vmem_limit_bytes=vmem_limit),
    )(gb, e_col, u_col, e_row, v_row, neg_row, h_bf, h_bf)

    return out[:n, :f_out]


def _graph_conv_reference(x, graph, weight, t_s, t_r):
    """Pure-JAX transcription of the PyTorch dense forward (for self-check)."""
    n = graph.shape[0]
    eye = jnp.eye(n, dtype=jnp.float32)
    h = x @ weight.T
    g0 = graph - jnp.diag(jnp.diagonal(graph))
    s1 = jnp.sum(g0, axis=1)
    s1 = jnp.where(s1 == 0.0, 1.0, s1)
    gn = jnp.diag(s1 ** -0.5) @ g0 @ jnp.diag(s1 ** -0.5)
    s2 = jnp.sum(gn, axis=1)
    s2 = jnp.where(s2 == 0.0, 1.0, s2)
    mask = jnp.diag(s2 ** -0.5) @ gn @ jnp.diag(s2 ** -0.5)
    c1 = jax.nn.leaky_relu(h @ t_s.T, 0.2)
    c2 = jax.nn.leaky_relu(h @ t_r.T, 0.2).T
    s = (mask * c1 + mask * c2) / 2
    s = jnp.where(mask <= 0.0, -1e11, s)
    p = jax.nn.softmax(s, axis=1)
    cm = p + eye
    s3 = jnp.sum(cm, axis=1)
    s3 = jnp.where(s3 == 0.0, 1.0, s3)
    c = jnp.diag(s3 ** -0.5) @ cm @ jnp.diag(s3 ** -0.5)
    return c @ h


if __name__ == "__main__":
    key = jax.random.PRNGKey(0)
    n, f_in, f_out = 16, 8, 32
    k1, k2, k3, k4, k5 = jax.random.split(key, 5)

    x = jax.random.normal(k1, (n, f_in), dtype=jnp.float32)
    a = jax.random.uniform(k2, (n, n), dtype=jnp.float32)
    graph = (((a + a.T) * 0.5) > 0.5).astype(jnp.float32)     # symmetric 0/1 adjacency

    # synthetic parameters (module's torch.empty params are uninitialized)
    weight = jax.random.normal(k3, (f_out, f_in), dtype=jnp.float32) * (2.0 / f_in) ** 0.5
    t_s = jax.random.normal(k4, (1, f_out), dtype=jnp.float32) * 0.1
    t_r = jax.random.normal(k5, (1, f_out), dtype=jnp.float32) * 0.1

    out = graph_conv(x, graph, weight, t_s, t_r)
    jax.block_until_ready(out)
    assert out.shape == (n, f_out)
    assert bool(jnp.all(jnp.isfinite(out)))

    ref = _graph_conv_reference(x, graph, weight, t_s, t_r)
    max_err = float(jnp.max(jnp.abs(out - ref)))
    assert bool(jnp.allclose(out, ref, rtol=5e-2, atol=5e-2)), f"max abs err {max_err}"
    print("KERNEL_OK")
</pallas_src>

<mosaic_0001>
module attributes {stable_mosaic.version = 11 : i64} {
  func.func @_project_kernel(%arg0: i32, %arg1: memref<16x8xf32, #tpu.memory_space<vmem>>, %arg2: memref<8x128xf32, #tpu.memory_space<vmem>>, %arg3: memref<128x128xf32, #tpu.memory_space<vmem>>, %arg4: memref<16x128xbf16, #tpu.memory_space<vmem>>, %arg5: memref<16x128xf32, #tpu.memory_space<vmem>>) attributes {dimension_semantics = [#tpu.dimension_semantics<parallel>], iteration_bounds = array<i64: 8>, scalar_prefetch = 0 : i64, scratch_operands = 0 : i64, tpu.core_type = #tpu.core_type<tc>, window_params = [{transform_indices = @transform_0, window_bounds = array<i64: 16, 8>}, {pipeline_mode = #tpu.pipeline_mode<synchronous>, transform_indices = @transform_1, window_bounds = array<i64: 8, 128>}, {pipeline_mode = #tpu.pipeline_mode<synchronous>, transform_indices = @transform_2, window_bounds = array<i64: 128, 128>}, {transform_indices = @transform_3, window_bounds = array<i64: 16, 128>}, {transform_indices = @transform_4, window_bounds = array<i64: 16, 128>}]} {
    %c0 = arith.constant 0 : index
    %c0_0 = arith.constant 0 : index
    %0 = vector.load %arg1[%c0, %c0_0] : memref<16x8xf32, #tpu.memory_space<vmem>>, vector<16x8xf32>
    %c0_1 = arith.constant 0 : index
    %c0_2 = arith.constant 0 : index
    %1 = vector.load %arg2[%c0_1, %c0_2] : memref<8x128xf32, #tpu.memory_space<vmem>>, vector<8x128xf32>
    %cst = arith.constant dense<0.000000e+00> : vector<16x128xf32>
    %2 = tpu.matmul %0, %1, %cst {dimension_numbers = #tpu.dot_dimension_numbers<[1], [0], [0], [1], [0, 0, 1, 1], [], []>} : vector<16x8xf32>, vector<8x128xf32>, vector<16x128xf32> -> vector<16x128xf32>
    %3 = arith.truncf %2 : vector<16x128xf32> to vector<16x128xbf16>
    %c0_3 = arith.constant 0 : index
    %c0_4 = arith.constant 0 : index
    %4 = vector.load %arg4[%c0_3, %c0_4] : memref<16x128xbf16, #tpu.memory_space<vmem>>, vector<16x128xbf16>
    tpu.vector_store %arg4[%c0_3, %c0_4], %3 {strides = array<i32>} : memref<16x128xbf16, #tpu.memory_space<vmem>>, vector<16x128xbf16>,
    %c0_5 = arith.constant 0 : index
    %c0_6 = arith.constant 0 : index
    %5 = vector.load %arg3[%c0_5, %c0_6] : memref<128x128xf32, #tpu.memory_space<vmem>>, vector<128x128xf32>
    %cst_7 = arith.constant dense<0.000000e+00> : vector<16x128xf32>
    %6 = tpu.matmul %2, %5, %cst_7 {dimension_numbers = #tpu.dot_dimension_numbers<[1], [0], [0], [1], [0, 0, 1, 1], [], []>} : vector<16x128xf32>, vector<128x128xf32>, vector<16x128xf32> -> vector<16x128xf32>
    %cst_8 = arith.constant 0.000000e+00 : f32
    %7 = vector.broadcast %cst_8 : f32 to vector<16x128xf32>
    %8 = arith.cmpf ogt, %6, %7 : vector<16x128xf32>
    %cst_9 = arith.constant 2.000000e-01 : f32
    %9 = vector.broadcast %cst_9 : f32 to vector<16x128xf32>
    %10 = arith.mulf %9, %6 : vector<16x128xf32>
    %11 = arith.select %8, %6, %10 : vector<16x128xi1>, vector<16x128xf32>
    %c0_10 = arith.constant 0 : index
    %c0_11 = arith.constant 0 : index
    %12 = vector.load %arg5[%c0_10, %c0_11] : memref<16x128xf32, #tpu.memory_space<vmem>>, vector<16x128xf32>
    tpu.vector_store %arg5[%c0_10, %c0_11], %11 {strides = array<i32>} : memref<16x128xf32, #tpu.memory_space<vmem>>, vector<16x128xf32>,
    return
  }
  func.func @transform_0(%arg0: i32) -> (i32, i32) {
    %c0_i32 = arith.constant 0 : i32
    %c0_i32_0 = arith.constant 0 : i32
    return %arg0, %c0_i32 : i32, i32
  }
  func.func @transform_1(%arg0: i32) -> (i32, i32) {
    %c0_i32 = arith.constant 0 : i32
    %c0_i32_0 = arith.constant 0 : i32
    %c0_i32_1 = arith.constant 0 : i32
    return %c0_i32, %c0_i32_0 : i32, i32
  }
  func.func @transform_2(%arg0: i32) -> (i32, i32) {
    %c0_i32 = arith.constant 0 : i32
    %c0_i32_0 = arith.constant 0 : i32
    %c0_i32_1 = arith.constant 0 : i32
    return %c0_i32, %c0_i32_0 : i32, i32
  }
  func.func @transform_3(%arg0: i32) -> (i32, i32) {
    %c0_i32 = arith.constant 0 : i32
    %c0_i32_0 = arith.constant 0 : i32
    return %arg0, %c0_i32 : i32, i32
  }
  func.func @transform_4(%arg0: i32) -> (i32, i32) {
    %c0_i32 = arith.constant 0 : i32
    %c0_i32_0 = arith.constant 0 : i32
    return %arg0, %c0_i32 : i32, i32
  }
}

module attributes {stable_mosaic.version = 11 : i64} {
  func.func @_attention_kernel(%arg0: i32, %arg1: i32, %arg2: memref<16x128xbf16, #tpu.memory_space<vmem>>, %arg3: memref<16x1xf32, #tpu.memory_space<vmem>>, %arg4: memref<16x1xf32, #tpu.memory_space<vmem>>, %arg5: memref<1x128xf32, #tpu.memory_space<vmem>>, %arg6: memref<1x128xf32, #tpu.memory_space<vmem>>, %arg7: memref<1x128xf32, #tpu.memory_space<vmem>>, %arg8: memref<128x128xbf16, #tpu.memory_space<vmem>>, %arg9: memref<16x128xbf16, #tpu.memory_space<vmem>>, %arg10: memref<16x128xf32, #tpu.memory_space<vmem>>, %arg11: memref<16x1xf32, #tpu.memory_space<vmem>>, %arg12: memref<16x1xf32, #tpu.memory_space<vmem>>, %arg13: memref<16x128xf32, #tpu.memory_space<vmem>>) attributes {dimension_semantics = [#tpu.dimension_semantics<parallel>, #tpu.dimension_semantics<arbitrary>], iteration_bounds = array<i64: 1, 1>, scalar_prefetch = 0 : i64, scratch_operands = 3 : i64, tpu.core_type = #tpu.core_type<tc>, window_params = [{transform_indices = @transform_0, window_bounds = array<i64: 16, 128>}, {transform_indices = @transform_1, window_bounds = array<i64: 16, 1>}, {transform_indices = @transform_2, window_bounds = array<i64: 16, 1>}, {transform_indices = @transform_3, window_bounds = array<i64: 1, 128>}, {transform_indices = @transform_4, window_bounds = array<i64: 1, 128>}, {transform_indices = @transform_5, window_bounds = array<i64: 1, 128>}, {transform_indices = @transform_6, window_bounds = array<i64: 128, 128>}, {transform_indices = @transform_7, window_bounds = array<i64: 16, 128>}, {transform_indices = @transform_8, window_bounds = array<i64: 16, 128>}]} {
    %c0_i32 = arith.constant 0 : i32
    %0 = arith.cmpi eq, %arg1, %c0_i32 : i32
    %1 = arith.extui %0 : i1 to i32
    %c0_i32_0 = arith.constant 0 : i32
    %2 = arith.cmpi ne, %1, %c0_i32_0 : i32
    scf.if %2 {
      %cst_31 = arith.constant -1.000000e+30 : f32
      %50 = vector.broadcast %cst_31 : f32 to vector<16x1xf32>
      %c0_32 = arith.constant 0 : index
      %c0_33 = arith.constant 0 : index
      %51 = vector.load %arg11[%c0_32, %c0_33] : memref<16x1xf32, #tpu.memory_space<vmem>>, vector<16x1xf32>
      tpu.vector_store %arg11[%c0_32, %c0_33], %50 {strides = array<i32>} : memref<16x1xf32, #tpu.memory_space<vmem>>, vector<16x1xf32>,
      %cst_34 = arith.constant 0.000000e+00 : f32
      %52 = vector.broadcast %cst_34 : f32 to vector<16x1xf32>
      %c0_35 = arith.constant 0 : index
      %c0_36 = arith.constant 0 : index
      %53 = vector.load %arg12[%c0_35, %c0_36] : memref<16x1xf32, #tpu.memory_space<vmem>>, vector<16x1xf32>
      tpu.vector_store %arg12[%c0_35, %c0_36], %52 {strides = array<i32>} : memref<16x1xf32, #tpu.memory_space<vmem>>, vector<16x1xf32>,
      %cst_37 = arith.constant 0.000000e+00 : f32
      %54 = vector.broadcast %cst_37 : f32 to vector<16x128xf32>
      %c0_38 = arith.constant 0 : index
      %c0_39 = arith.constant 0 : index
      %55 = vector.load %arg13[%c0_38, %c0_39] : memref<16x128xf32, #tpu.memory_space<vmem>>, vector<16x128xf32>
      tpu.vector_store %arg13[%c0_38, %c0_39], %54 {strides = array<i32>} : memref<16x128xf32, #tpu.memory_space<vmem>>, vector<16x128xf32>,
    } else {
    }
    %c0 = arith.constant 0 : index
    %c0_1 = arith.constant 0 : index
    %3 = vector.load %arg2[%c0, %c0_1] : memref<16x128xbf16, #tpu.memory_space<vmem>>, vector<16x128xbf16>
    %4 = arith.extf %3 : vector<16x128xbf16> to vector<16x128xf32>
    %c0_2 = arith.constant 0 : index
    %c0_3 = arith.constant 0 : index
    %5 = vector.load %arg5[%c0_2, %c0_3] : memref<1x128xf32, #tpu.memory_space<vmem>>, vector<1x128xf32>
    %c0_4 = arith.constant 0 : index
    %c0_5 = arith.constant 0 : index
    %6 = vector.load %arg4[%c0_4, %c0_5] : memref<16x1xf32, #tpu.memory_space<vmem>>, vector<16x1xf32>
    %7 = vector.broadcast %5 : vector<1x128xf32> to vector<16x128xf32>
    %8 = vector.broadcast %6 : vector<16x1xf32> to vector<16x128xf32>
    %9 = arith.mulf %7, %8 : vector<16x128xf32>
    %c0_6 = arith.constant 0 : index
    %c0_7 = arith.constant 0 : index
    %10 = vector.load %arg3[%c0_6, %c0_7] : memref<16x1xf32, #tpu.memory_space<vmem>>, vector<16x1xf32>
    %c0_8 = arith.constant 0 : index
    %c0_9 = arith.constant 0 : index
    %11 = vector.load %arg6[%c0_8, %c0_9] : memref<1x128xf32, #tpu.memory_space<vmem>>, vector<1x128xf32>
    %12 = vector.broadcast %10 : vector<16x1xf32> to vector<16x128xf32>
    %13 = vector.broadcast %11 : vector<1x128xf32> to vector<16x128xf32>
    %14 = arith.mulf %12, %13 : vector<16x128xf32>
    %15 = arith.addf %9, %14 : vector<16x128xf32>
    %16 = arith.mulf %4, %15 : vector<16x128xf32>
    %cst = arith.constant 0.000000e+00 : f32
    %17 = vector.broadcast %cst : f32 to vector<16x128xf32>
    %18 = arith.cmpf ogt, %4, %17 : vector<16x128xf32>
    %c0_10 = arith.constant 0 : index
    %c0_11 = arith.constant 0 : index
    %19 = vector.load %arg7[%c0_10, %c0_11] : memref<1x128xf32, #tpu.memory_space<vmem>>, vector<1x128xf32>
    %20 = vector.shape_cast %19 : vector<1x128xf32> to vector<1x128xf32>
    %21 = vector.broadcast %20 : vector<1x128xf32> to vector<16x128xf32>
    %22 = arith.select %18, %16, %21 : vector<16x128xi1>, vector<16x128xf32>
    %c0_12 = arith.constant 0 : index
    %c0_13 = arith.constant 0 : index
    %23 = vector.load %arg11[%c0_12, %c0_13] : memref<16x1xf32, #tpu.memory_space<vmem>>, vector<16x1xf32>
    %cst_14 = arith.constant dense<0xFF800000> : vector<16xf32>
    %24 = vector.multi_reduction <maximumf>, %22, %cst_14 [1] : vector<16x128xf32> to vector<16xf32>
    %25 = vector.shape_cast %24 : vector<16xf32> to vector<16x1xf32>
    %26 = arith.maximumf %23, %25 : vector<16x1xf32>
    %27 = arith.subf %23, %26 : vector<16x1xf32>
    %28 = math.exp %27 : vector<16x1xf32>
    %29 = vector.broadcast %26 : vector<16x1xf32> to vector<16x128xf32>
    %30 = arith.subf %22, %29 : vector<16x128xf32>
    %31 = math.exp %30 : vector<16x128xf32>
    %c0_15 = arith.constant 0 : index
    %c0_16 = arith.constant 0 : index
    %32 = vector.load %arg12[%c0_15, %c0_16] : memref<16x1xf32, #tpu.memory_space<vmem>>, vector<16x1xf32>
    %33 = arith.mulf %28, %32 : vector<16x1xf32>
    %cst_17 = arith.constant dense<0.000000e+00> : vector<16xf32>
    %34 = vector.multi_reduction <add>, %31, %cst_17 [1] : vector<16x128xf32> to vector<16xf32>
    %35 = vector.shape_cast %34 : vector<16xf32> to vector<16x1xf32>
    %36 = arith.addf %33, %35 : vector<16x1xf32>
    %c0_18 = arith.constant 0 : index
    %c0_19 = arith.constant 0 : index
    %37 = vector.load %arg12[%c0_18, %c0_19] : memref<16x1xf32, #tpu.memory_space<vmem>>, vector<16x1xf32>
    tpu.vector_store %arg12[%c0_18, %c0_19], %36 {strides = array<i32>} : memref<16x1xf32, #tpu.memory_space<vmem>>, vector<16x1xf32>,
    %c0_20 = arith.constant 0 : index
    %c0_21 = arith.constant 0 : index
    %38 = vector.load %arg13[%c0_20, %c0_21] : memref<16x128xf32, #tpu.memory_space<vmem>>, vector<16x128xf32>
    %39 = vector.broadcast %28 : vector<16x1xf32> to vector<16x128xf32>
    %40 = arith.mulf %39, %38 : vector<16x128xf32>
    %41 = arith.truncf %31 : vector<16x128xf32> to vector<16x128xbf16>
    %c0_22 = arith.constant 0 : index
    %c0_23 = arith.constant 0 : index
    %42 = vector.load %arg8[%c0_22, %c0_23] : memref<128x128xbf16, #tpu.memory_space<vmem>>, vector<128x128xbf16>
    %cst_24 = arith.constant dense<0.000000e+00> : vector<16x128xf32>
    %43 = tpu.matmul %41, %42, %cst_24 {dimension_numbers = #tpu.dot_dimension_numbers<[1], [0], [0], [1], [0, 0, 1, 1], [], []>} : vector<16x128xbf16>, vector<128x128xbf16>, vector<16x128xf32> -> vector<16x128xf32>
    %44 = arith.addf %40, %43 : vector<16x128xf32>
    %c0_25 = arith.constant 0 : index
    %c0_26 = arith.constant 0 : index
    %45 = vector.load %arg13[%c0_25, %c0_26] : memref<16x128xf32, #tpu.memory_space<vmem>>, vector<16x128xf32>
    tpu.vector_store %arg13[%c0_25, %c0_26], %44 {strides = array<i32>} : memref<16x128xf32, #tpu.memory_space<vmem>>, vector<16x128xf32>,
    %c0_27 = arith.constant 0 : index
    %c0_28 = arith.constant 0 : index
    %46 = vector.load %arg11[%c0_27, %c0_28] : memref<16x1xf32, #tpu.memory_space<vmem>>, vector<16x1xf32>
    tpu.vector_store %arg11[%c0_27, %c0_28], %26 {strides = array<i32>} : memref<16x1xf32, #tpu.memory_space<vmem>>, vector<16x1xf32>,
    %c0_i32_29 = arith.constant 0 : i32
    %47 = arith.cmpi eq, %arg1, %c0_i32_29 : i32
    %48 = arith.extui %47 : i1 to i32
    %c0_i32_30 = arith.constant 0 : i32
    %49 = arith.cmpi ne, %48, %c0_i32_30 : i32
    scf.if %49 {
      %c0_31 = arith.constant 0 : index
      %c0_32 = arith.constant 0 : index
      %50 = vector.load %arg12[%c0_31, %c0_32] : memref<16x1xf32, #tpu.memory_space<vmem>>, vector<16x1xf32>
      %51 = tpu.reciprocal %50 {approx = true} : vector<16x1xf32> -> vector<16x1xf32>
      %c0_33 = arith.constant 0 : index
      %c0_34 = arith.constant 0 : index
      %52 = vector.load %arg13[%c0_33, %c0_34] : memref<16x128xf32, #tpu.memory_space<vmem>>, vector<16x128xf32>
      %53 = vector.broadcast %51 : vector<16x1xf32> to vector<16x128xf32>
      %54 = arith.mulf %52, %53 : vector<16x128xf32>
      %c0_35 = arith.constant 0 : index
      %c0_36 = arith.constant 0 : index
      %55 = vector.load %arg9[%c0_35, %c0_36] : memref<16x128xbf16, #tpu.memory_space<vmem>>, vector<16x128xbf16>
      %56 = arith.extf %55 : vector<16x128xbf16> to vector<16x128xf32>
      %57 = arith.addf %54, %56 : vector<16x128xf32>
      %cst_37 = arith.constant 5.000000e-01 : f32
      %58 = vector.broadcast %cst_37 : f32 to vector<16x128xf32>
      %59 = arith.mulf %58, %57 : vector<16x128xf32>
      %c0_38 = arith.constant 0 : index
      %c0_39 = arith.constant 0 : index
      %60 = vector.load %arg10[%c0_38, %c0_39] : memref<16x128xf32, #tpu.memory_space<vmem>>, vector<16x128xf32>
      tpu.vector_store %arg10[%c0_38, %c0_39], %59 {strides = array<i32>} : memref<16x128xf32, #tpu.memory_space<vmem>>, vector<16x128xf32>,
    } else {
    }
    return
  }
  func.func @transform_0(%arg0: i32, %arg1: i32) -> (i32, i32) {
    %c0_i32 = arith.constant 0 : i32
    return %arg0, %arg1 : i32, i32
  }
  func.func @transform_1(%arg0: i32, %arg1: i32) -> (i32, i32) {
    %c0_i32 = arith.constant 0 : i32
    %c0_i32_0 = arith.constant 0 : i32
    return %arg0, %c0_i32 : i32, i32
  }
  func.func @transform_2(%arg0: i32, %arg1: i32) -> (i32, i32) {
    %c0_i32 = arith.constant 0 : i32
    %c0_i32_0 = arith.constant 0 : i32
    return %arg0, %c0_i32 : i32, i32
  }
  func.func @transform_3(%arg0: i32, %arg1: i32) -> (i32, i32) {
    %c0_i32 = arith.constant 0 : i32
    %c0_i32_0 = arith.constant 0 : i32
    return %c0_i32, %arg1 : i32, i32
  }
  func.func @transform_4(%arg0: i32, %arg1: i32) -> (i32, i32) {
    %c0_i32 = arith.constant 0 : i32
    %c0_i32_0 = arith.constant 0 : i32
    return %c0_i32, %arg1 : i32, i32
  }
  func.func @transform_5(%arg0: i32, %arg1: i32) -> (i32, i32) {
    %c0_i32 = arith.constant 0 : i32
    %c0_i32_0 = arith.constant 0 : i32
    return %c0_i32, %arg1 : i32, i32
  }
  func.func @transform_6(%arg0: i32, %arg1: i32) -> (i32, i32) {
    %c0_i32 = arith.constant 0 : i32
    %c0_i32_0 = arith.constant 0 : i32
    return %arg1, %c0_i32 : i32, i32
  }
  func.func @transform_7(%arg0: i32, %arg1: i32) -> (i32, i32) {
    %c0_i32 = arith.constant 0 : i32
    %c0_i32_0 = arith.constant 0 : i32
    return %arg0, %c0_i32 : i32, i32
  }
  func.func @transform_8(%arg0: i32, %arg1: i32) -> (i32, i32) {
    %c0_i32 = arith.constant 0 : i32
    %c0_i32_0 = arith.constant 0 : i32
    return %arg0, %c0_i32 : i32, i32
  }
}

</mosaic_0001>

<bundles_post_ra>
// kernel: graph_conv.2
= control target key start
LH: loop header
LB: loop body
LE: loop exit
PB: predicated region body
PF: predicated region fallthrough
CT: control target
= control target key end

     0   :  { %s657_s15 = smov 0   ;;  %s736_s0 = inlined_call_operand.vmem [shape: f32[128,8], index: 0, kind: input, shape index: {}]   ;;  %s737_s1 = inlined_call_operand.vmem [shape: f32[8,128], index: 1, kind: input, shape index: {}]   ;;  %s738_s2 = inlined_call_operand.vmem [shape: f32[128,128], index: 2, kind: input, shape index: {}]   ;;  %s739_s3 = inlined_call_operand.vmem [shape: bf16[128,128], index: 3, kind: output, shape index: {0}]   ;;  %s740_s4 = inlined_call_operand.vmem [shape: f32[128,128], index: 4, kind: output, shape index: {1}]  }
   0x1 LB: > { %s499_s16 = sadd.s32 4294967295, %s630_s15   ;;  %p503_p0 = scmp.ge.s32.totalorder %s630_s15, 1  ;;  %s630_s15 = sphi %s657_s15, %s15_s15  }
   0x2   : > { %p166_p1 = scmp.lt.s32.totalorder %s630_s15, 9 }
   0x4   : > { %p167_p2 = pnand %p503_p0, %p166_p1 }
   0x5   : > { %v217_v0 = vld [vmem:[%s737_s1] sm:$0xff] (!%p167_p2)  ;;  %s504_s19 = sshll.u32 (!%p167_p2), %s499_s16, 1  ;;  %v311_v2 = vld [vmem:[%s738_s2 + $0x8] sm:$0xff] (!%p167_p2)  ;;  %v312_v4 = vld [vmem:[%s738_s2 + $0x10] sm:$0xff] (!%p167_p2)  ;;  %vm218_vm0 = vcmask (!%p167_p2), 64512  }
   0x6   : > { %170 = sbr.rel (%p167_p2) target bundleno = 449 (0x1c1), region = 32  ;;  %v310_v1 = vld [vmem:[%s738_s2] sm:$0xff] (!%p167_p2)  ;;  %544 = vmatprep.subr.mxu0 (!%p167_p2), %v217_v0  ;;  %p198_p3 = scmp.lt.s32.totalorder (!%p167_p2), %s504_s19, 15  ;;  %v313_v5 = vld [vmem:[%s738_s2 + $0x18] sm:$0xff] (!%p167_p2)  ;;  %v315_v8 = vld [vmem:[%s738_s2 + $0x28] sm:$0xff] (!%p167_p2) }
   0x7   : > { %v584_v3 = vpack.c.bf16 (!%p167_p2), %v311_v2, %v310_v1  ;;  %545 = vmatpush3.msra.mxu0 (!%p167_p2), %v217_v0  ;;  %v588_v6 = vpack.c.bf16 (!%p167_p2), %v313_v5, %v312_v4  ;;  %v314_v7 = vld [vmem:[%s738_s2 + $0x20] sm:$0xff] (!%p167_p2)  ;;  %v316_v10 = vld [vmem:[%s738_s2 + $0x30] sm:$0xff] (!%p167_p2)  ;;  %v317_v11 = vld [vmem:[%s738_s2 + $0x38] sm:$0xff] (!%p167_p2) }
   0x8   : > { %v592_v9 = vpack.c.bf16 (!%p167_p2), %v315_v8, %v314_v7  ;;  %v596_v14 = vpack.c.bf16 (!%p167_p2), %v317_v11, %v316_v10  ;;  %v318_v15 = vld [vmem:[%s738_s2 + $0x40] sm:$0xff] (!%p167_p2)  ;;  %v319_v16 = vld [vmem:[%s738_s2 + $0x48] sm:$0xff] (!%p167_p2)  ;;  %v320_v18 = vld [vmem:[%s738_s2 + $0x50] sm:$0xff] (!%p167_p2) }
   0x9   : > { %585 = vmatprep.subr.bf16.mxu1 (!%p167_p2), %v584_v3  ;;  %v600_v17 = vpack.c.bf16 (!%p167_p2), %v319_v16, %v318_v15  ;;  %v321_v19 = vld [vmem:[%s738_s2 + $0x58] sm:$0xff] (!%p167_p2)  ;;  %v322_v21 = vld [vmem:[%s738_s2 + $0x60] sm:$0xff] (!%p167_p2)  ;;  %v323_v22 = vld [vmem:[%s738_s2 + $0x68] sm:$0xff] (!%p167_p2) }
   0xa   : > { %587 = vmatpush3.bf16.msra.mxu1 (!%p167_p2), %v584_v3  ;;  %v604_v20 = vpack.c.bf16 (!%p167_p2), %v321_v19, %v320_v18  ;;  %v608_v23 = vpack.c.bf16 (!%p167_p2), %v323_v22, %v322_v21  ;;  %v324_v24 = vld [vmem:[%s738_s2 + $0x70] sm:$0xff] (!%p167_p2)  ;;  %v325_v25 = vld [vmem:[%s738_s2 + $0x78] sm:$0xff] (!%p167_p2) }
   0xb   : > { %589 = vmatprep.subr.bf16.mxu1 (!%p167_p2), %v588_v6  ;;  %v612_v26 = vpack.c.bf16 (!%p167_p2), %v325_v25, %v324_v24 }
   0xd   : > { %s742_s19 = smov (!%p198_p3, %s504_s19), 15 }
   0xe   : > { %s505_s6 = sshll.u32 %s742_s19, 3  ;;  %591 = vmatpush3.bf16.msra.mxu1 %v588_v6  ;;  %s507_s7 = sshll.u32 %s742_s19, 2 }
   0xf   : > { %s201_s9 = scalar_lea.vmem %s736_s0, %s505_s6  ;;  %593 = vmatprep.subr.bf16.mxu1 %v592_v9  ;;  %s207_s10 = scalar_lea.vmem %s739_s3, %s507_s7 }
  0x10   : > { %v215_v12 = vld [vmem:[%s201_s9] sm:$0xff]  ;;  %v216_v13 = vld [vmem:[%s201_s9 + $0x8] sm:$0xff]  ;;  %s213_s13 = scalar_lea.vmem %s740_s4, %s505_s6 }
  0x11   : > { %546 = vmatprep.mubr.msk.f32.mxu0 %vm218_vm0, %v215_v12 }
  0x12   : > { %547 = vmatmul.mubr.msk.f32.vlgmr.msra.gmra.mrb[0].mxu0 %vm218_vm0, %v216_v13  ;;  %595 = vmatpush3.bf16.msra.mxu1 %v592_v9 }
  0x13   : > { %597 = vmatprep.subr.bf16.mxu1 %v596_v14 }
  0x16   : > { %599 = vmatpush3.bf16.msra.mxu1 %v596_v14 }
  0x17   : > { %601 = vmatprep.subr.bf16.mxu1 %v600_v17 }
  0x1a   : > { %603 = vmatpush3.bf16.msra.mxu1 %v600_v17 }
  0x1b   : > { %605 = vmatprep.subr.bf16.mxu1 %v604_v20 }
  0x1e   : > { %607 = vmatpush3.bf16.msra.mxu1 %v604_v20 }
  0x1f   : > { %609 = vmatprep.subr.bf16.mxu1 %v608_v23 }
  0x22   : > { %611 = vmatpush3.bf16.msra.mxu1 %v608_v23 }
  0x23   : > { %613 = vmatprep.subr.bf16.mxu1 %v612_v26 }
  0x26   : > { %615 = vmatpush3.bf16.msra.mxu1 %v612_v26 }
  0xe5   : > { %v548_v27 = vpop.f32.mrb[0].mxu0 }
  0xe6   : > { %v291_v28 = vpop.f32.mrb[1].mxu0 }
  0xe7   : > { %v521_v29 = vpack.c.bf16 %v548_v27, %v291_v28  ;;  %581 = vmatprep.mubr.f32.mxu1 %v291_v28 }
  0xe8   : > { %582 = vmatmul.mubr.f32.vlgmr.msra.gmra.mrb[0].mxu1 %v548_v27 }
  0xe9   : > { %522 = vst [vmem:[%s207_s10] sm:$0xff] %v521_v29  }
 0x1bb   : > { %v583_v30 = vpop.f32.mrb[0].mxu1 }
 0x1bc   : > { %vm402_vm1 = vcmp.gt.f32.partialorder %v583_v30, 0.0  ;;  %v404_v31 = vmul.f32 0.2, %v583_v30  ;;  %v392_v32 = vpop.f32.mrb[1].mxu1 }
 0x1bd   : > { %vm401_vm2 = vcmp.gt.f32.partialorder %v392_v32, 0.0  ;;  %v403_v33 = vmul.f32 0.2, %v392_v32 }
 0x1be   : > { %v406_v34 = vsel %vm402_vm1, %v583_v30, %v404_v31 }
 0x1bf   : > { %408 = vst [vmem:[%s213_s13 + $0x8] sm:$0xff] %v406_v34  ;;  %v405_v35 = vsel %vm401_vm2, %v392_v32, %v403_v33 }
 0x1c0   : > { %407 = vst [vmem:[%s213_s13] sm:$0xff] %v405_v35 }
 0x1c1 PF: > { %s15_s15 = sadd.s32 1, %s630_s15  }
 0x1c2   : > { %p12_p4 = scmp.ge.s32.totalorder %s15_s15, 10  }
 0x1c4   :  { %14 = sbr.rel (!%p12_p4) target bundleno = 1 (0x1), region = 74 }

// kernel: graph_conv.3
= control target key start
LH: loop header
LB: loop body
LE: loop exit
PB: predicated region body
PF: predicated region fallthrough
CT: control target
= control target key end

     0   :  { %v420_v2 = vmov 0   ;;  %s543_s0 = inlined_call_operand.vmem [shape: bf16[16,128], index: 0, kind: input, shape index: {}]   ;;  %s544_s1 = inlined_call_operand.vmem [shape: f32[16,1], index: 1, kind: input, shape index: {}]   ;;  %s545_s2 = inlined_call_operand.vmem [shape: f32[16,1], index: 2, kind: input, shape index: {}]   ;;  %s546_s3 = inlined_call_operand.vmem [shape: f32[1,128], index: 3, kind: input, shape index: {}]   ;;  %s547_s4 = inlined_call_operand.vmem [shape: f32[1,128], index: 4, kind: input, shape index: {}]   ;;  %s548_s5 = inlined_call_operand.vmem [shape: f32[1,128], index: 5, kind: input, shape index: {}]   ;;  %s549_s6 = inlined_call_operand.vmem [shape: bf16[128,128], index: 6, kind: input, shape index: {}, may-alias: {6,7}]   ;;  %s550_s7 = inlined_call_operand.vmem [shape: bf16[128,128], index: 7, kind: input, shape index: {}, may-alias: {6,7}]   ;;  %s551_s8 = inlined_call_operand.hbm [shape: f32[16,128], index: 8, kind: output, shape index: {}]  }
   0x1   :  { %v67_v0 = vld [vmem:[%s544_s1] sm:$0xff]  ;;  %375 = vset.pattern.permute.xlu1 %v420_v2  ;;  %374 = vset.pattern.permute.xlu0 %v420_v2  ;;  %v68_v3 = vld [vmem:[%s544_s1 + $0x8] sm:$0xff] }
   0x2   :  { %v47_v1 = vld [vmem:[%s545_s2] sm:$0xff]  ;;  %72 = vperm.xlu1 %375, %v67_v0   ;;  %v48_v4 = vld [vmem:[%s545_s2 + $0x8] sm:$0xff] }
   0x3   :  { %57 = vperm.xlu0 %374, %v47_v1  }
   0x6   :  { %77 = vperm.xlu1 %375, %v68_v3  }
   0x7   :  { %62 = vperm.xlu0 %374, %v48_v4  }
   0x8   :  { %13 = vsyncpa [#allocation6], 0  ;;  %v331_v5 = vld [vmem:[%s543_s0] sm:$0xff]   ;;  %vm35_vm2 = vcmask 7168   ;;  %v421_v25 = vmov -1e+30  }
   0x9   :  { %v320_v6 = vld [vmem:[%s547_s4] ss:$0 sm:$0xff]  ;;  %v332_v10 = vunpack.c.l.bf16 %v331_v5  ;;  %v333_v16 = vunpack.c.h.bf16 %v331_v5  ;;  %36 = vst.msk [vmem:[#allocation2] sm:$0xff] %vm35_vm2, %v421_v25  ;;  %37 = vst.msk [vmem:[#allocation2 + $0x8] sm:$0xff] %vm35_vm2, %v421_v25  ;;  %v422_v26 = vmov 0.0   ;;  %v377_v28 = vld [vmem:[%s549_s6 + $0x8] sm:$0xff]  }
   0xa   :  { %v319_v7 = vld [vmem:[%s546_s3] ss:$0 sm:$0xff]  ;;  %347 = vmatprep.subr.bf16.mxu0 %v422_v26  ;;  %38 = vst.msk [vmem:[#allocation3] sm:$0xff] %vm35_vm2, %v422_v26  ;;  %39 = vst.msk [vmem:[#allocation3 + $0x8] sm:$0xff] %vm35_vm2, %v422_v26  ;;  %v378_v29 = vld [vmem:[%s549_s6 + $0x10] sm:$0xff]   ;;  %vm423_vm3 = vmmov 0  }
   0xb   :  { %vm92_vm0 = vcmp.gt.f32.partialorder %v332_v10, 0.0  ;;  %v321_v17 = vld [vmem:[%s548_s5] ss:$0 sm:$0xff]  ;;  %vm93_vm1 = vcmp.gt.f32.partialorder %v333_v16, 0.0  ;;  %v379_v35 = vld [vmem:[%s549_s6 + $0x18] sm:$0xff]   ;;  %v381_v40 = vld [vmem:[%s549_s6 + $0x28] sm:$0xff]   ;;  %363 = vmatprep.mubr.msk.bf16.mxu0 %vm423_vm3, %v422_v26 }
   0xc   :  { %v376_v27 = vld [vmem:[%s549_s6] sm:$0xff]   ;;  %v382_v41 = vld [vmem:[%s549_s6 + $0x30] sm:$0xff]   ;;  %v383_v42 = vld [vmem:[%s549_s6 + $0x38] sm:$0xff]   ;;  %s424_s10 = smov [#allocation5]  }
   0xd   :  { %348 = vmatpush3.bf16.msra.mxu0 %v376_v27  ;;  %v380_v39 = vld [vmem:[%s549_s6 + $0x20] sm:$0xff]   ;;  %s308_s11 = sshll.u32 %s424_s10, 4  ;;  %s309_s11 = int_to_ptr.vmem [resolvable:$true] %s308_s11 }
   0xe   :  { %349 = vmatprep.subr.bf16.mxu0 %v422_v26  ;;  %p401_p1 = scmp.lt.s32.totalorder %s309_s11, %s309_s11 }
  0x10   :  { %v103_v30 = vld [vmem:[#allocation2] sm:$0xff]  ;;  %v104_v33 = vld [vmem:[#allocation2 + $0x8] sm:$0xff] }
  0x11   :  { %350 = vmatpush3.bf16.msra.mxu0 %v377_v28  ;;  %v133_v56 = vld [vmem:[#allocation3] sm:$0xff]  ;;  %v134_v59 = vld [vmem:[#allocation3 + $0x8] sm:$0xff] }
  0x12   :  { %351 = vmatprep.subr.bf16.mxu0 %v422_v26 }
  0x15   :  { %352 = vmatpush3.bf16.msra.mxu0 %v378_v29 }
  0x16   :  { %353 = vmatprep.subr.bf16.mxu0 %v422_v26 }
  0x19   :  { %354 = vmatpush3.bf16.msra.mxu0 %v379_v35 }
  0x1a   :  { %355 = vmatprep.subr.bf16.mxu0 %v422_v26 }
  0x1d   :  { %356 = vmatpush3.bf16.msra.mxu0 %v380_v39 }
  0x1e   :  { %357 = vmatprep.subr.bf16.mxu0 %v422_v26 }
  0x21   :  { %358 = vmatpush3.bf16.msra.mxu0 %v381_v40 }
  0x22   :  { %359 = vmatprep.subr.bf16.mxu0 %v422_v26 }
  0x25   :  { %360 = vmatpush3.bf16.msra.mxu0 %v382_v41 }
  0x26   :  { %361 = vmatprep.subr.bf16.mxu0 %v422_v26 }
  0x29   :  { %362 = vmatpush3.bf16.msra.mxu0 %v383_v42 }
  0x81   :  { %v73_v8 = vpop.permute.xlu1 %72 }
  0x82   :  { %v58_v9 = vpop.permute.xlu0 %57  ;;  %v86_v11 = vmul.f32 %v320_v6, %v73_v8 }
  0x83   :  { %v65_v12 = vmul.f32 %v319_v7, %v58_v9  ;;  %v335_v9 = vld [vmem:[%s550_s7] sm:$0xff]   ;;  %s396_s7 = scalar_lea.vmem %s309_s11, 256 }
  0x84   :  { %p397_p0 = scmp.ne.s32.totalorder %s309_s11, %s396_s7  ;;  %p402_p2 = scmp.lt.s32.totalorder %s396_s7, %s396_s7 }
  0x85   :  { %v88_v13 = vadd.f32 %v86_v11, %v65_v12  ;;  %v78_v14 = vpop.permute.xlu1 %77 }
  0x86   :  { %v63_v15 = vpop.permute.xlu0 %62  ;;  %v87_v19 = vmul.f32 %v320_v6, %v78_v14  ;;  %p403_p3 = por %p402_p2, %p401_p1 }
  0x87   :  { %v90_v18 = vmul.f32 %v332_v10, %v88_v13  ;;  %v66_v20 = vmul.f32 %v319_v7, %v63_v15  ;;  %v336_v13 = vunpack.c.l.bf16 %v335_v9 }
  0x88   :  { %p404_p4 = pnand %p403_p3, %p397_p0 }
  0x89   :  { %v89_v21 = vadd.f32 %v87_v19, %v66_v20  ;;  %v101_v22 = vsel %vm92_vm0, %v90_v18, %v321_v17  ;;  %v337_v19 = vunpack.c.h.bf16 %v335_v9 }
  0x8a   :  { %105 = vmax.xlane.f32.xlu0 %v101_v22 }
  0x8b   :  { %v91_v23 = vmul.f32 %v333_v16, %v89_v21 }
  0x8d   :  { %v102_v24 = vsel %vm93_vm1, %v91_v23, %v321_v17 }
  0x8e   :  { %107 = vmax.xlane.f32.xlu1 %v102_v24 }
 0x117   :  { %v106_v31 = vpop.xlane.xlu0 %105 }
 0x118   :  { %v109_v32 = vmax.f32 %v103_v30, %v106_v31 }
 0x11a   :  { %v111_v34 = vsub.f32 %v103_v30, %v109_v32  ;;  %270 = vst.msk [vmem:[#allocation2] sm:$0xff] %vm35_vm2, %v109_v32  ;;  %119 = vperm.xlu0 %374, %v109_v32  }
 0x11b   :  { %v108_v36 = vpop.xlane.xlu1 %107 }
 0x11c   :  { %v110_v37 = vmax.f32 %v104_v33, %v108_v36  ;;  %v113_v53 = vmul.f32 1.442695, %v111_v34 }
 0x11e   :  { %v112_v38 = vsub.f32 %v104_v33, %v110_v37  ;;  %271 = vst.msk [vmem:[#allocation2 + $0x8] sm:$0xff] %vm35_vm2, %v110_v37  ;;  %124 = vperm.xlu1 %375, %v110_v37  }
 0x120   :  { %v115_v52 = vmul.f32 1.442695, %v112_v38 }
 0x199   :  { %v120_v43 = vpop.permute.xlu0 %119 }
 0x19a   :  { %v127_v44 = vsub.f32 %v101_v22, %v120_v43 }
 0x19c   :  { %v129_v45 = vmul.f32 1.442695, %v127_v44 }
 0x19d   :  { %v125_v46 = vpop.permute.xlu1 %124 }
 0x19e   :  { %384 = vpow2.f32 %v129_v45  ;;  %v128_v47 = vsub.f32 %v102_v24, %v125_v46 }
 0x1a0   :  { %v131_v48 = vmul.f32 1.442695, %v128_v47 }
 0x1a2   :  { %386 = vpow2.f32 %v131_v48 }
 0x1a3   :  { %388 = vpow2.f32 %v115_v52 }
 0x1a4   :  { %390 = vpow2.f32 %v113_v53 }
 0x1a8   :  { %v385_v49 = vpop.eup %384 }
 0x1a9   :  { %137 = vadd.xlane.f32.xlu0 %v385_v49 }
 0x1ac   :  { %v387_v50 = vpop.eup %386 }
 0x1ad   :  { %139 = vadd.xlane.f32.xlu1 %v387_v50  ;;  %v160_v51 = vpack.c.bf16 %v387_v50, %v385_v49  ;;  %v389_v54 = vpop.eup %388 }
 0x1ae   :  { %v391_v55 = vpop.eup %390  ;;  %v136_v61 = vmul.f32 %v389_v54, %v134_v59 }
 0x1af   :  { %364 = vmatmul.mubr.bf16.vlgmr.msra.gmra.mrb[0].mxu0 %v160_v51  ;;  %v135_v57 = vmul.f32 %v391_v55, %v133_v56 }
 0x1be   :  { %155 = vperm.xlu1 %375, %v389_v54  }
 0x1bf   :  { %150 = vperm.xlu0 %374, %v391_v55  }
 0x236   :  { %v138_v58 = vpop.xlane.xlu0 %137 }
 0x237   :  { %v141_v60 = vadd.f32 %v138_v58, %v135_v57 }
 0x239   :  { %144 = vst.msk [vmem:[#allocation3] sm:$0xff] %vm35_vm2, %v141_v60 }
 0x23a   :  { %v140_v62 = vpop.xlane.xlu1 %139 }
 0x23b   :  { %v142_v63 = vadd.f32 %v140_v62, %v136_v61 }
 0x23d   :  { %145 = vst.msk [vmem:[#allocation3 + $0x8] sm:$0xff] %vm35_vm2, %v142_v63 }
 0x23e   :  { %v151_v8 = vpop.permute.xlu0 %150  ;;  %v156_v11 = vpop.permute.xlu1 %155 }
 0x23f   :  { %v158_v10 = vmul.f32 0.0, %v151_v8  ;;  %v159_v15 = vmul.f32 0.0, %v156_v11 }
 0x240   :  { %v275_v0 = vld [vmem:[#allocation3] sm:$0xff] }
 0x241   :  { %392 = vrcp.f32 %v275_v0 }
 0x244   :  { %v276_v1 = vld [vmem:[#allocation3 + $0x8] sm:$0xff] }
 0x245   :  { %394 = vrcp.f32 %v276_v1 }
 0x24b   :  { %v393_v2 = vpop.eup %392 }
 0x24c   :  { %283 = vperm.xlu0 %374, %v393_v2  }
 0x24f   :  { %v395_v3 = vpop.eup %394 }
 0x250   :  { %288 = vperm.xlu1 %375, %v395_v3  }
 0x282   :  { %v259_v4 = vpop.f32.mrb[0].mxu0 }
 0x283   :  { %v365_v5 = vpop.f32.mrb[1].mxu0  ;;  %v266_v12 = vadd.f32 %v259_v4, %v158_v10 }
 0x284   :  { %v262_v6 = vpop.f32.mrb[2].mxu0 }
 0x285   :  { %v366_v7 = vpop.f32.mrb[3].mxu0  ;;  %v267_v17 = vadd.f32 %v262_v6, %v159_v15 }
 0x2cb   :  { %v284_v14 = vpop.permute.xlu0 %283 }
 0x2cc   :  { %v291_v16 = vmul.f32 %v284_v14, %v266_v12 }
 0x2ce   :  { %v297_v18 = vadd.f32 %v336_v13, %v291_v16 }
 0x2cf   :  { %v289_v20 = vpop.permute.xlu1 %288 }
 0x2d0   :  { %v299_v21 = vmul.f32 0.5, %v297_v18  ;;  %v292_v22 = vmul.f32 %v289_v20, %v267_v17 }
 0x2d2   :  { %301 = vst [vmem:[#allocation5] sm:$0xff] %v299_v21  ;;  %v298_v23 = vadd.f32 %v337_v19, %v292_v22 }
 0x2d4   :  { %v300_v24 = vmul.f32 0.5, %v298_v23 }
 0x2d6   :  { %302 = vst [vmem:[#allocation5 + $0x8] sm:$0xff] %v300_v24 }
 0x2d7   :  { %407 = shalt.err (!%p404_p4)
}
 0x2d8   :  { %s408_s14 = scalar_lea.hbm %s551_s8, 256 }
 0x2d9   :  { %p409_p5 = scmp.ne.s32.totalorder %s551_s8, %s408_s14  ;;  %p412_p6 = scmp.lt.u32.totalorder %s408_s14, %s551_s8 }
 0x2db   :  { %p414_p7 = pnand %p412_p6, %p409_p5 }
 0x2dd   :  { %417 = shalt.err (!%p414_p7)
}
 0x2de   :  { %s425_s1 = smov 128   ;;  %s426_s0 = smov 8  }
 0x2df   :  { %314 = dma.vmem_to_hbm [thread:$0]  %s309_s11, 256, %s551_s8, [#allocation6], %s425_s1, %s425_s1, %s426_s0  }
 0x2e0   :  { %418 = dma.done.wait [#allocation6], 256  }
 0x2e1   :  { %419 = vsyncadd [#allocation6], 4294967040 }
 0x2e2   :  { %318 = vsyncpa [#allocation6], 1 }

</bundles_post_ra>
